<compile_context>
chip_gen: v7x
topology: tpu7x:2x2x1
jax: 0.10.0
libtpu: 0.0.40
codegen_flags: <defaults>
</compile_context>

<pallas_src>
import jax
import jax.numpy as jnp
from jax.experimental import pallas as pl
from jax.experimental.pallas import tpu as pltpu


def _round_up(n: int, m: int) -> int:
    return ((n + m - 1) // m) * m


def _linear_kernel(x_ref, w_ref, b_ref, o_ref):
    # x_ref: [TB, D] (VMEM tile), w_ref: [1, D] (VMEM, resident across grid),
    # b_ref: [1] (SMEM scalar), o_ref: [TB, 1] (VMEM output tile).
    x = x_ref[...]                                        # [TB, D] f32
    w = w_ref[...]                                        # [1, D]  f32 (broadcasts)
    b = b_ref[0]                                          # scalar  f32
    # VPU elementwise multiply + canonical lane reduction with keepdims.
    row_sums = jnp.sum(x * w, axis=-1, keepdims=True)     # [TB, 1] f32
    o_ref[...] = (row_sums + b).astype(o_ref.dtype)


def not_simple_nn_forward(x, weight, bias, *, block_batch: int = 512):
    """y = x @ weight.T + bias, matching nn.Linear(input_size, 1, bias=True).

    x: [B, D] float, weight: [1, D] (PyTorch layout), bias: [1]. Returns [B, 1].
    """
    B, D = x.shape
    x = x.astype(jnp.float32)

    # Cap the double-buffered x tile (2 * TB * D * 4 bytes) at ~8 MiB so the
    # default scoped-VMEM budget is safe on v5e (16 MiB) as well as v6e/v7x.
    vmem_cap_bytes = 8 * 1024 * 1024
    tb_cap = max(128, (vmem_cap_bytes // max(1, 2 * 4 * D)) // 128 * 128)
    TB = min(block_batch, _round_up(B, 128), tb_cap)
    TB = _round_up(TB, 128)

    B_pad = _round_up(B, TB)
    num_tiles = B_pad // TB
    if B_pad != B:
        # Padded rows compute 0*w + bias and are sliced away below.
        x = jnp.pad(x, ((0, B_pad - B), (0, 0)))

    w_row = weight.reshape(1, D).astype(jnp.float32)   # [1, D] (VMEM resident)
    b1 = bias.reshape(1).astype(jnp.float32)           # [1]    (SMEM scalar)

    out = pl.pallas_call(
        _linear_kernel,
        out_shape=jax.ShapeDtypeStruct((B_pad, 1), jnp.float32),
        grid_spec=pltpu.PrefetchScalarGridSpec(
            num_scalar_prefetch=0,
            grid=(num_tiles,),
            in_specs=[
                pl.BlockSpec((TB, D), lambda i: (i, 0)),            # x tile (pipelined)
                pl.BlockSpec((1, D), lambda i: (0, 0)),             # weight (resident)
                pl.BlockSpec(memory_space=pltpu.MemorySpace.SMEM),  # bias scalar
            ],
            out_specs=pl.BlockSpec((TB, 1), lambda i: (i, 0)),      # [TB, 1] out tile
        ),
        compiler_params=pltpu.CompilerParams(
            dimension_semantics=("parallel",),   # megacore sharding on v7x
        ),
        cost_estimate=pl.CostEstimate(
            flops=2 * B_pad * D,
            bytes_accessed=4 * (B_pad * D + D + B_pad),
            transcendentals=0,
        ),
    )(x, w_row, b1)

    return out[:B, :]


if __name__ == "__main__":
    key = jax.random.PRNGKey(0)
    kx, kw, kb = jax.random.split(key, 3)

    # Small shapes consistent with the module: NotSimpleNN(input_size=32), batch=2.
    batch, input_size = 2, 32
    x = jax.random.normal(kx, (batch, input_size), dtype=jnp.float32)
    weight = jax.random.normal(kw, (1, input_size), dtype=jnp.float32) * 0.1
    bias = jax.random.normal(kb, (1,), dtype=jnp.float32) * 0.1

    out = jax.block_until_ready(not_simple_nn_forward(x, weight, bias))
    ref = x @ weight.T + bias
    assert out.shape == (batch, 1)
    assert jnp.allclose(out, ref, atol=1e-5, rtol=1e-5), (out, ref)

    # Also exercise the multi-tile grid + batch-tail padding path.
    kx2, kw2, kb2 = jax.random.split(jax.random.PRNGKey(0), 3)
    B2, D2 = 1200, 256
    x2 = jax.random.normal(kx2, (B2, D2), dtype=jnp.float32)
    w2 = jax.random.normal(kw2, (1, D2), dtype=jnp.float32) * 0.05
    b2 = jax.random.normal(kb2, (1,), dtype=jnp.float32) * 0.05
    out2 = jax.block_until_ready(not_simple_nn_forward(x2, w2, b2))
    ref2 = x2 @ w2.T + b2
    assert out2.shape == (B2, 1)
    assert jnp.allclose(out2, ref2, atol=1e-4, rtol=1e-4), float(
        jnp.max(jnp.abs(out2 - ref2))
    )

    print("KERNEL_OK")
</pallas_src>

<mosaic_0001>
module attributes {stable_mosaic.version = 11 : i64} {
  func.func @_linear_kernel(%arg0: i32, %arg1: memref<128x32xf32, #tpu.memory_space<vmem>>, %arg2: memref<1x32xf32, #tpu.memory_space<vmem>>, %arg3: memref<1xf32, #tpu.memory_space<smem>>, %arg4: memref<128x1xf32, #tpu.memory_space<vmem>>) attributes {dimension_semantics = [#tpu.dimension_semantics<parallel>], iteration_bounds = array<i64: 1>, scalar_prefetch = 0 : i64, scratch_operands = 0 : i64, tpu.core_type = #tpu.core_type<tc>, window_params = [{transform_indices = @transform_0, window_bounds = array<i64: 128, 32>}, {pipeline_mode = #tpu.pipeline_mode<synchronous>, transform_indices = @transform_1, window_bounds = array<i64: 1, 32>}, {transform_indices = @transform_2, window_bounds = array<i64: 1>}, {transform_indices = @transform_3, window_bounds = array<i64: 128, 1>}]} {
    %c0 = arith.constant 0 : index
    %c0_0 = arith.constant 0 : index
    %0 = vector.load %arg1[%c0, %c0_0] : memref<128x32xf32, #tpu.memory_space<vmem>>, vector<128x32xf32>
    %c0_1 = arith.constant 0 : index
    %c0_2 = arith.constant 0 : index
    %1 = vector.load %arg2[%c0_1, %c0_2] : memref<1x32xf32, #tpu.memory_space<vmem>>, vector<1x32xf32>
    %c0_3 = arith.constant 0 : index
    %2 = memref.load %arg3[%c0_3] : memref<1xf32, #tpu.memory_space<smem>>
    %3 = vector.broadcast %1 : vector<1x32xf32> to vector<128x32xf32>
    %4 = arith.mulf %0, %3 : vector<128x32xf32>
    %cst = arith.constant dense<0.000000e+00> : vector<128xf32>
    %5 = vector.multi_reduction <add>, %4, %cst [1] : vector<128x32xf32> to vector<128xf32>
    %6 = vector.shape_cast %5 : vector<128xf32> to vector<128x1xf32>
    %7 = vector.broadcast %2 : f32 to vector<128x1xf32>
    %8 = arith.addf %6, %7 : vector<128x1xf32>
    %c0_4 = arith.constant 0 : index
    %c0_5 = arith.constant 0 : index
    %9 = vector.load %arg4[%c0_4, %c0_5] : memref<128x1xf32, #tpu.memory_space<vmem>>, vector<128x1xf32>
    tpu.vector_store %arg4[%c0_4, %c0_5], %8 {strides = array<i32>} : memref<128x1xf32, #tpu.memory_space<vmem>>, vector<128x1xf32>,
    return
  }
  func.func @transform_0(%arg0: i32) -> (i32, i32) {
    %c0_i32 = arith.constant 0 : i32
    %c0_i32_0 = arith.constant 0 : i32
    return %arg0, %c0_i32 : i32, i32
  }
  func.func @transform_1(%arg0: i32) -> (i32, i32) {
    %c0_i32 = arith.constant 0 : i32
    %c0_i32_0 = arith.constant 0 : i32
    %c0_i32_1 = arith.constant 0 : i32
    return %c0_i32, %c0_i32_0 : i32, i32
  }
  func.func @transform_2(%arg0: i32) -> i32 {
    %c0_i32 = arith.constant 0 : i32
    %c0_i32_0 = arith.constant 0 : i32
    return %c0_i32 : i32
  }
  func.func @transform_3(%arg0: i32) -> (i32, i32) {
    %c0_i32 = arith.constant 0 : i32
    %c0_i32_0 = arith.constant 0 : i32
    return %arg0, %c0_i32 : i32, i32
  }
}

</mosaic_0001>

<bundles_post_ra>
// kernel: tpu_custom_call.1
= control target key start
LH: loop header
LB: loop body
LE: loop exit
PB: predicated region body
PF: predicated region fallthrough
CT: control target
= control target key end

     0   :  { %vm55_vm0 = vcmask 261120   ;;  %vm121_vm1 = vcmask 7168   ;;  %s297_s0 = inlined_call_operand.vmem [shape: f32[128,32], index: 0, kind: input, shape index: {}]   ;;  %s298_s1 = inlined_call_operand.vmem [shape: f32[1,32], index: 1, kind: input, shape index: {}]   ;;  %s299_s2 = inlined_call_operand.<no memory space> [shape: f32[1], index: 2, kind: input, shape index: {}]   ;;  %s300_s3 = inlined_call_operand.vmem [shape: f32[128,1], index: 3, kind: output, shape index: {}]  }
   0x1   :  { %v17_v0 = vld [vmem:[%s297_s0 + $0x10] sm:$0xff]  ;;  %v142_v1 = vld [vmem:[%s298_s1] ss:$0 sm:$0xff]  ;;  %v18_v5 = vld [vmem:[%s297_s0 + $0x18] sm:$0xff]  ;;  %v104_v49 = vstv %s299_s2 }
   0x2   :  { %v15_v2 = vld [vmem:[%s297_s0] sm:$0xff]  ;;  %v41_v3 = vmul.f32 %v142_v1, %v17_v0  ;;  %v16_v6 = vld [vmem:[%s297_s0 + $0x8] sm:$0xff]  ;;  %v42_v7 = vmul.f32 %v142_v1, %v18_v5  ;;  %v22_v17 = vld [vmem:[%s297_s0 + $0x38] sm:$0xff] }
   0x3   :  { %v39_v4 = vmul.f32 %v142_v1, %v15_v2  ;;  %v40_v8 = vmul.f32 %v142_v1, %v16_v6  ;;  %v20_v9 = vld [vmem:[%s297_s0 + $0x28] sm:$0xff]  ;;  %v19_v10 = vld [vmem:[%s297_s0 + $0x20] sm:$0xff]  ;;  %v21_v18 = vld [vmem:[%s297_s0 + $0x30] sm:$0xff]  ;;  %v46_v21 = vmul.f32 %v142_v1, %v22_v17 }
   0x4   :  { %v62_v11 = vsel %vm55_vm0, %v41_v3, 0.0  ;;  %v65_v13 = vsel %vm55_vm0, %v42_v7, 0.0  ;;  %v44_v15 = vmul.f32 %v142_v1, %v20_v9  ;;  %v43_v16 = vmul.f32 %v142_v1, %v19_v10  ;;  %v24_v23 = vld [vmem:[%s297_s0 + $0x48] sm:$0xff]  ;;  %v23_v24 = vld [vmem:[%s297_s0 + $0x40] sm:$0xff]  ;;  %v26_v29 = vld [vmem:[%s297_s0 + $0x58] sm:$0xff] }
   0x5   :  { %v56_v12 = vsel %vm55_vm0, %v39_v4, 0.0  ;;  %63 = vadd.xlane.f32.xlu1 %v62_v11  ;;  %v59_v14 = vsel %vm55_vm0, %v40_v8, 0.0  ;;  %v45_v22 = vmul.f32 %v142_v1, %v21_v18  ;;  %v77_v25 = vsel %vm55_vm0, %v46_v21, 0.0  ;;  %v25_v30 = vld [vmem:[%s297_s0 + $0x50] sm:$0xff]  ;;  %v28_v35 = vld [vmem:[%s297_s0 + $0x68] sm:$0xff]  ;;  %v27_v36 = vld [vmem:[%s297_s0 + $0x60] sm:$0xff] }
   0x6   :  { %57 = vadd.xlane.f32.xlu0 %v56_v12  ;;  %v71_v19 = vsel %vm55_vm0, %v44_v15, 0.0  ;;  %v68_v20 = vsel %vm55_vm0, %v43_v16, 0.0  ;;  %v48_v27 = vmul.f32 %v142_v1, %v24_v23  ;;  %v47_v28 = vmul.f32 %v142_v1, %v23_v24  ;;  %v30_v41 = vld [vmem:[%s297_s0 + $0x78] sm:$0xff]  ;;  %v29_v42 = vld [vmem:[%s297_s0 + $0x70] sm:$0xff] }
   0x7   :  { %v74_v26 = vsel %vm55_vm0, %v45_v22, 0.0  ;;  %v50_v33 = vmul.f32 %v142_v1, %v26_v29  ;;  %v49_v34 = vmul.f32 %v142_v1, %v25_v30  ;;  %v52_v39 = vmul.f32 %v142_v1, %v28_v35 }
   0x8   :  { %v83_v31 = vsel %vm55_vm0, %v48_v27, 0.0  ;;  %v80_v32 = vsel %vm55_vm0, %v47_v28, 0.0  ;;  %v51_v40 = vmul.f32 %v142_v1, %v27_v36  ;;  %v54_v45 = vmul.f32 %v142_v1, %v30_v41 }
   0x9   :  { %66 = vadd.xlane.f32.xlu1 %v65_v13  ;;  %v89_v37 = vsel %vm55_vm0, %v50_v33, 0.0  ;;  %v86_v38 = vsel %vm55_vm0, %v49_v34, 0.0  ;;  %v95_v43 = vsel %vm55_vm0, %v52_v39, 0.0  ;;  %v53_v46 = vmul.f32 %v142_v1, %v29_v42 }
   0xa   :  { %60 = vadd.xlane.f32.xlu0 %v59_v14  ;;  %v92_v44 = vsel %vm55_vm0, %v51_v40, 0.0  ;;  %v101_v47 = vsel %vm55_vm0, %v54_v45, 0.0 }
   0xb   :  { %v98_v48 = vsel %vm55_vm0, %v53_v46, 0.0 }
   0xd   :  { %72 = vadd.xlane.f32.xlu1 %v71_v19 }
   0xe   :  { %69 = vadd.xlane.f32.xlu0 %v68_v20 }
  0x11   :  { %78 = vadd.xlane.f32.xlu1 %v77_v25 }
  0x12   :  { %75 = vadd.xlane.f32.xlu0 %v74_v26 }
  0x15   :  { %84 = vadd.xlane.f32.xlu1 %v83_v31 }
  0x16   :  { %81 = vadd.xlane.f32.xlu0 %v80_v32 }
  0x19   :  { %90 = vadd.xlane.f32.xlu1 %v89_v37 }
  0x1a   :  { %87 = vadd.xlane.f32.xlu0 %v86_v38 }
  0x1d   :  { %96 = vadd.xlane.f32.xlu1 %v95_v43 }
  0x1e   :  { %93 = vadd.xlane.f32.xlu0 %v92_v44 }
  0x21   :  { %102 = vadd.xlane.f32.xlu1 %v101_v47 }
  0x22   :  { %99 = vadd.xlane.f32.xlu0 %v98_v48 }
  0x92   :  { %v64_v50 = vpop.xlane.xlu1 %63 }
  0x93   :  { %v58_v51 = vpop.xlane.xlu0 %57  ;;  %v107_v52 = vadd.f32 %v104_v49, %v64_v50 }
  0x94   :  { %v105_v53 = vadd.f32 %v104_v49, %v58_v51 }
  0x95   :  { %124 = vst.msk [vmem:[%s300_s3 + $0x10] sm:$0xff] %vm121_vm1, %v107_v52 }
  0x96   :  { %122 = vst.msk [vmem:[%s300_s3] sm:$0xff] %vm121_vm1, %v105_v53  ;;  %v67_v54 = vpop.xlane.xlu1 %66 }
  0x97   :  { %v61_v55 = vpop.xlane.xlu0 %60  ;;  %v108_v56 = vadd.f32 %v104_v49, %v67_v54 }
  0x98   :  { %v106_v57 = vadd.f32 %v104_v49, %v61_v55 }
  0x99   :  { %125 = vst.msk [vmem:[%s300_s3 + $0x18] sm:$0xff] %vm121_vm1, %v108_v56 }
  0x9a   :  { %123 = vst.msk [vmem:[%s300_s3 + $0x8] sm:$0xff] %vm121_vm1, %v106_v57  ;;  %v73_v58 = vpop.xlane.xlu1 %72 }
  0x9b   :  { %v70_v59 = vpop.xlane.xlu0 %69  ;;  %v110_v60 = vadd.f32 %v104_v49, %v73_v58 }
  0x9c   :  { %v109_v61 = vadd.f32 %v104_v49, %v70_v59 }
  0x9d   :  { %127 = vst.msk [vmem:[%s300_s3 + $0x28] sm:$0xff] %vm121_vm1, %v110_v60 }
  0x9e   :  { %126 = vst.msk [vmem:[%s300_s3 + $0x20] sm:$0xff] %vm121_vm1, %v109_v61  ;;  %v79_v62 = vpop.xlane.xlu1 %78 }
  0x9f   :  { %v76_v63 = vpop.xlane.xlu0 %75  ;;  %v112_v0 = vadd.f32 %v104_v49, %v79_v62 }
  0xa0   :  { %v111_v1 = vadd.f32 %v104_v49, %v76_v63 }
  0xa1   :  { %129 = vst.msk [vmem:[%s300_s3 + $0x38] sm:$0xff] %vm121_vm1, %v112_v0 }
  0xa2   :  { %128 = vst.msk [vmem:[%s300_s3 + $0x30] sm:$0xff] %vm121_vm1, %v111_v1  ;;  %v85_v2 = vpop.xlane.xlu1 %84 }
  0xa3   :  { %v82_v3 = vpop.xlane.xlu0 %81  ;;  %v114_v4 = vadd.f32 %v104_v49, %v85_v2 }
  0xa4   :  { %v113_v5 = vadd.f32 %v104_v49, %v82_v3 }
  0xa5   :  { %131 = vst.msk [vmem:[%s300_s3 + $0x48] sm:$0xff] %vm121_vm1, %v114_v4 }
  0xa6   :  { %130 = vst.msk [vmem:[%s300_s3 + $0x40] sm:$0xff] %vm121_vm1, %v113_v5  ;;  %v91_v6 = vpop.xlane.xlu1 %90 }
  0xa7   :  { %v88_v7 = vpop.xlane.xlu0 %87  ;;  %v116_v8 = vadd.f32 %v104_v49, %v91_v6 }
  0xa8   :  { %v115_v9 = vadd.f32 %v104_v49, %v88_v7 }
  0xa9   :  { %133 = vst.msk [vmem:[%s300_s3 + $0x58] sm:$0xff] %vm121_vm1, %v116_v8 }
  0xaa   :  { %132 = vst.msk [vmem:[%s300_s3 + $0x50] sm:$0xff] %vm121_vm1, %v115_v9  ;;  %v97_v10 = vpop.xlane.xlu1 %96 }
  0xab   :  { %v94_v11 = vpop.xlane.xlu0 %93  ;;  %v118_v12 = vadd.f32 %v104_v49, %v97_v10 }
  0xac   :  { %v117_v13 = vadd.f32 %v104_v49, %v94_v11 }
  0xad   :  { %135 = vst.msk [vmem:[%s300_s3 + $0x68] sm:$0xff] %vm121_vm1, %v118_v12 }
  0xae   :  { %134 = vst.msk [vmem:[%s300_s3 + $0x60] sm:$0xff] %vm121_vm1, %v117_v13  ;;  %v103_v14 = vpop.xlane.xlu1 %102 }
  0xaf   :  { %v100_v15 = vpop.xlane.xlu0 %99  ;;  %v120_v16 = vadd.f32 %v104_v49, %v103_v14 }
  0xb0   :  { %v119_v17 = vadd.f32 %v104_v49, %v100_v15 }
  0xb1   :  { %137 = vst.msk [vmem:[%s300_s3 + $0x78] sm:$0xff] %vm121_vm1, %v120_v16 }
  0xb2   :  { %136 = vst.msk [vmem:[%s300_s3 + $0x70] sm:$0xff] %vm121_vm1, %v119_v17 }

</bundles_post_ra>
